<compile_context>
chip_gen: v5e
topology: v5e:2x2
jax: 0.10.0
libtpu: 0.0.40
codegen_flags: <defaults>
</compile_context>

<pallas_src>
import functools

import jax
import jax.numpy as jnp
from jax.experimental import pallas as pl
from jax.experimental.pallas import tpu as pltpu


def _contrastive_kernel(o1_ref, o2_ref, t_ref, loss_ref, *, margin, eps):
    # o1_ref / o2_ref: (block_b, D) feature tiles in their native dtype.
    # t_ref / loss_ref: (1, 1, block_b) lane-dense target / per-row loss tiles.
    diff = o2_ref[...].astype(jnp.float32) - o1_ref[...].astype(jnp.float32)
    # Row-sum of squares (lane reduction, XLU), then relayout to a lane-dense
    # (1, 1, block_b) row so the epilogue and the store are lane-dense.
    dist = jnp.sum(diff * diff, axis=1).reshape(1, 1, -1)       # (1, 1, block_b)
    t = t_ref[...].astype(jnp.float32)                          # (1, 1, block_b)
    hinge = jnp.maximum(margin - jnp.sqrt(dist + eps), 0.0)     # sqrt -> EUP
    loss_ref[...] = 0.5 * (t * dist + (1.0 - t) * (hinge * hinge))


def _round_up(x, m):
    return ((x + m - 1) // m) * m


def _vmem_limit_bytes():
    """Half of physical VMEM: 64 MiB on v5e/v6e (128 MiB), 32 MiB on v7x (64 MiB)."""
    cap = 64 << 20  # conservative fallback = v7x per-core VMEM (smallest)
    try:
        cap = int(pltpu.get_tpu_info().vmem_capacity_bytes)
    except Exception:
        pass
    return max(32 << 20, min(cap // 2, 96 << 20))


def _pick_block_b(B, D, itemsize, pack, tile_budget_bytes):
    """Largest batch tile (multiple of the dtype's sublane packing) whose
    double-buffered footprint for the two feature inputs fits the budget.
    The lane dim pads to a multiple of 128 in VMEM, so account for that."""
    if B <= pack:
        return B                                     # single full-array block
    d_pad = _round_up(D, 128)
    bytes_per_row = 2 * 2 * d_pad * itemsize         # 2 inputs x 2 pipeline buffers
    rows = max(pack, tile_budget_bytes // bytes_per_row)
    rows = min(rows, (B // pack) * pack)             # never exceed the packed batch
    if B >= 2 * pack:
        # Keep >= 2 grid steps so the "parallel" axis can shard across v7x's
        # two TensorCores (and DMA overlaps compute on single-core parts).
        rows = min(rows, _round_up(-(-B // 2), pack))
    return max(pack, (rows // pack) * pack)


def contrastive_loss(output1, output2, target, *, margin, size_average=True,
                     eps=1e-9, block_b=None):
    """Pallas implementation of ContrastiveLoss.forward.

    output1, output2: (B, D) float arrays (f32/bf16/...).
    target:           (B,) or (B, 1) labels (0/1 or soft labels in [0, 1]).
    """
    B, D = output1.shape
    assert output2.shape == (B, D)

    itemsize = jnp.dtype(output1.dtype).itemsize
    pack = max(8, 32 // itemsize)                    # f32:8, bf16:16, int8:32

    vmem_limit = _vmem_limit_bytes()
    if block_b is None:
        block_b = _pick_block_b(B, D, itemsize, pack,
                                tile_budget_bytes=vmem_limit - (8 << 20))

    num_blocks = -(-B // block_b)
    Bp = num_blocks * block_b

    # Target: tiny (B floats), so padding + reshaping it lane-dense is free.
    # The big (B, D) feature matrices are NOT padded; the ragged last grid
    # block reads unspecified rows whose losses are sliced off below.
    t_flat = target.reshape(-1).astype(jnp.float32)
    if Bp != B:
        t_flat = jnp.pad(t_flat, (0, Bp - B))
    t_in = t_flat.reshape(num_blocks, 1, block_b)

    kernel = functools.partial(
        _contrastive_kernel, margin=float(margin), eps=float(eps))

    per_row = pl.pallas_call(
        kernel,
        out_shape=jax.ShapeDtypeStruct((num_blocks, 1, block_b), jnp.float32),
        grid_spec=pltpu.PrefetchScalarGridSpec(
            num_scalar_prefetch=0,
            grid=(num_blocks,),
            in_specs=[
                pl.BlockSpec((block_b, D), lambda i: (i, 0)),
                pl.BlockSpec((block_b, D), lambda i: (i, 0)),
                pl.BlockSpec((1, 1, block_b), lambda i: (i, 0, 0)),
            ],
            out_specs=pl.BlockSpec((1, 1, block_b), lambda i: (i, 0, 0)),
        ),
        compiler_params=pltpu.CompilerParams(
            dimension_semantics=("parallel",),
            vmem_limit_bytes=vmem_limit,
        ),
    )(output1, output2, t_in)

    losses = per_row.reshape(-1)[:B]
    return jnp.mean(losses) if size_average else jnp.sum(losses)


def _reference(output1, output2, target, margin, size_average=True, eps=1e-9):
    o1 = output1.astype(jnp.float32)
    o2 = output2.astype(jnp.float32)
    d = jnp.sum((o2 - o1) ** 2, axis=1)
    t = target.reshape(-1).astype(jnp.float32)
    hinge = jnp.maximum(margin - jnp.sqrt(d + eps), 0.0)
    losses = 0.5 * (t * d + (1.0 - t) * hinge ** 2)
    return jnp.mean(losses) if size_average else jnp.sum(losses)


if __name__ == "__main__":
    key = jax.random.PRNGKey(0)
    margin = 1.0
    ks = jax.random.split(key, 9)

    # Case 1: small, divisible batch (single block), 0/1 integer labels.
    B, D = 8, 32
    o1 = jax.random.normal(ks[0], (B, D), dtype=jnp.float32)
    o2 = jax.random.normal(ks[1], (B, D), dtype=jnp.float32)
    tgt = jax.random.bernoulli(ks[2], 0.5, (B,)).astype(jnp.int32)

    loss = jax.block_until_ready(contrastive_loss(o1, o2, tgt, margin=margin))
    ref = _reference(o1, o2, tgt, margin)
    assert jnp.allclose(loss, ref, rtol=1e-5, atol=1e-5), (loss, ref)

    loss_s = jax.block_until_ready(
        contrastive_loss(o1, o2, tgt, margin=margin, size_average=False))
    ref_s = _reference(o1, o2, tgt, margin, size_average=False)
    assert jnp.allclose(loss_s, ref_s, rtol=1e-5, atol=1e-5), (loss_s, ref_s)

    # Case 2: batch not a multiple of the tile (ragged last block, no feature
    # padding) + soft / fractional targets (float path, no int truncation).
    B2, D2 = 10, 32
    o1b = jax.random.normal(ks[3], (B2, D2), dtype=jnp.float32)
    o2b = jax.random.normal(ks[4], (B2, D2), dtype=jnp.float32)
    tgtb = jax.random.uniform(ks[5], (B2,), dtype=jnp.float32)

    loss2 = jax.block_until_ready(
        contrastive_loss(o1b, o2b, tgtb, margin=margin))
    ref2 = _reference(o1b, o2b, tgtb, margin)
    assert jnp.allclose(loss2, ref2, rtol=1e-5, atol=1e-5), (loss2, ref2)

    # Case 3: multi-block ragged batch with bf16 features (native-width
    # streaming, f32 math in-kernel).
    B3, D3 = 300, 64
    o1c = jax.random.normal(ks[6], (B3, D3), dtype=jnp.bfloat16)
    o2c = jax.random.normal(ks[7], (B3, D3), dtype=jnp.bfloat16)
    tgtc = jax.random.bernoulli(ks[8], 0.5, (B3,)).astype(jnp.int32)

    loss3 = jax.block_until_ready(
        contrastive_loss(o1c, o2c, tgtc, margin=margin))
    ref3 = _reference(o1c, o2c, tgtc, margin)
    assert jnp.allclose(loss3, ref3, rtol=1e-4, atol=1e-5), (loss3, ref3)

    print("KERNEL_OK")
</pallas_src>

<mosaic_0001>
module attributes {stable_mosaic.version = 11 : i64} {
  func.func @_contrastive_kernel(%arg0: i32, %arg1: memref<8x32xf32, #tpu.memory_space<vmem>>, %arg2: memref<8x32xf32, #tpu.memory_space<vmem>>, %arg3: memref<1x1x8xf32, #tpu.memory_space<vmem>>, %arg4: memref<1x1x8xf32, #tpu.memory_space<vmem>>) attributes {dimension_semantics = [#tpu.dimension_semantics<parallel>], iteration_bounds = array<i64: 1>, scalar_prefetch = 0 : i64, scratch_operands = 0 : i64, tpu.core_type = #tpu.core_type<tc>, window_params = [{transform_indices = @transform_0, window_bounds = array<i64: 8, 32>}, {transform_indices = @transform_1, window_bounds = array<i64: 8, 32>}, {transform_indices = @transform_2, window_bounds = array<i64: 1, 1, 8>}, {transform_indices = @transform_3, window_bounds = array<i64: 1, 1, 8>}]} {
    %c0 = arith.constant 0 : index
    %c0_0 = arith.constant 0 : index
    %0 = vector.load %arg2[%c0, %c0_0] : memref<8x32xf32, #tpu.memory_space<vmem>>, vector<8x32xf32>
    %c0_1 = arith.constant 0 : index
    %c0_2 = arith.constant 0 : index
    %1 = vector.load %arg1[%c0_1, %c0_2] : memref<8x32xf32, #tpu.memory_space<vmem>>, vector<8x32xf32>
    %2 = arith.subf %0, %1 : vector<8x32xf32>
    %3 = arith.mulf %2, %2 : vector<8x32xf32>
    %cst = arith.constant dense<0.000000e+00> : vector<8xf32>
    %4 = vector.multi_reduction <add>, %3, %cst [1] : vector<8x32xf32> to vector<8xf32>
    %5 = vector.shape_cast %4 : vector<8xf32> to vector<1x1x8xf32>
    %c0_3 = arith.constant 0 : index
    %c0_4 = arith.constant 0 : index
    %c0_5 = arith.constant 0 : index
    %6 = vector.load %arg3[%c0_3, %c0_4, %c0_5] : memref<1x1x8xf32, #tpu.memory_space<vmem>>, vector<1x1x8xf32>
    %cst_6 = arith.constant 9.99999971E-10 : f32
    %7 = vector.broadcast %cst_6 : f32 to vector<1x1x8xf32>
    %8 = arith.addf %5, %7 : vector<1x1x8xf32>
    %9 = math.sqrt %8 : vector<1x1x8xf32>
    %cst_7 = arith.constant 1.000000e+00 : f32
    %10 = vector.broadcast %cst_7 : f32 to vector<1x1x8xf32>
    %11 = arith.subf %10, %9 : vector<1x1x8xf32>
    %cst_8 = arith.constant 0.000000e+00 : f32
    %12 = vector.broadcast %cst_8 : f32 to vector<1x1x8xf32>
    %13 = arith.maximumf %11, %12 : vector<1x1x8xf32>
    %14 = arith.mulf %6, %5 : vector<1x1x8xf32>
    %cst_9 = arith.constant 1.000000e+00 : f32
    %15 = vector.broadcast %cst_9 : f32 to vector<1x1x8xf32>
    %16 = arith.subf %15, %6 : vector<1x1x8xf32>
    %17 = arith.mulf %13, %13 : vector<1x1x8xf32>
    %18 = arith.mulf %16, %17 : vector<1x1x8xf32>
    %19 = arith.addf %14, %18 : vector<1x1x8xf32>
    %cst_10 = arith.constant 5.000000e-01 : f32
    %20 = vector.broadcast %cst_10 : f32 to vector<1x1x8xf32>
    %21 = arith.mulf %20, %19 : vector<1x1x8xf32>
    %c0_11 = arith.constant 0 : index
    %c0_12 = arith.constant 0 : index
    %c0_13 = arith.constant 0 : index
    %22 = vector.load %arg4[%c0_11, %c0_12, %c0_13] : memref<1x1x8xf32, #tpu.memory_space<vmem>>, vector<1x1x8xf32>
    tpu.vector_store %arg4[%c0_11, %c0_12, %c0_13], %21 {strides = array<i32>} : memref<1x1x8xf32, #tpu.memory_space<vmem>>, vector<1x1x8xf32>,
    return
  }
  func.func @transform_0(%arg0: i32) -> (i32, i32) {
    %c0_i32 = arith.constant 0 : i32
    %c0_i32_0 = arith.constant 0 : i32
    return %arg0, %c0_i32 : i32, i32
  }
  func.func @transform_1(%arg0: i32) -> (i32, i32) {
    %c0_i32 = arith.constant 0 : i32
    %c0_i32_0 = arith.constant 0 : i32
    return %arg0, %c0_i32 : i32, i32
  }
  func.func @transform_2(%arg0: i32) -> (i32, i32, i32) {
    %c0_i32 = arith.constant 0 : i32
    %c0_i32_0 = arith.constant 0 : i32
    %c0_i32_1 = arith.constant 0 : i32
    return %arg0, %c0_i32, %c0_i32_0 : i32, i32, i32
  }
  func.func @transform_3(%arg0: i32) -> (i32, i32, i32) {
    %c0_i32 = arith.constant 0 : i32
    %c0_i32_0 = arith.constant 0 : i32
    %c0_i32_1 = arith.constant 0 : i32
    return %arg0, %c0_i32, %c0_i32_0 : i32, i32, i32
  }
}

</mosaic_0001>

<bundles_post_ra>
// kernel: tpu_custom_call.1
= control target key start
LH: loop header
LB: loop body
LE: loop exit
PB: predicated region body
PF: predicated region fallthrough
CT: control target
= control target key end

     0   :  { %8 = vsyncpa [#allocation3], 0  ;;  %s277_s0 = inlined_call_operand.hbm [shape: f32[8,32], index: 0, kind: input, shape index: {}]   ;;  %s278_s1 = inlined_call_operand.hbm [shape: f32[8,32], index: 1, kind: input, shape index: {}]   ;;  %s279_s2 = inlined_call_operand.vmem [shape: f32[1,1,8], index: 2, kind: input, shape index: {}]   ;;  %s280_s3 = inlined_call_operand.hbm [shape: f32[1,1,8], index: 3, kind: output, shape index: {}]  }
   0x1   :  { %9 = vsyncpa [#allocation6], 0 }
   0x2   :  { %10 = vsyncpa [#allocation4], 0  ;;  %s16_s14 = sshll.u32 %s277_s0, 4  ;;  %s241_s15 = smov [#allocation2]   ;;  %s17_s14 = int_to_ptr.hbm [resolvable:$true] %s16_s14 }
   0x3   :  { %s18_s16 = sshll.u32 %s241_s15, 4  ;;  %s27_s19 = sshll.u32 %s278_s1, 4  ;;  %s19_s16 = int_to_ptr.vmem [resolvable:$true] %s18_s16  ;;  %s28_s19 = int_to_ptr.hbm [resolvable:$true] %s27_s19 }
   0x4   :  { %21 = dma.hbm_to_vmem [thread:$0]  %s17_s14, 128, %s19_s16, [#allocation3]  }
   0x5   :  { %s242_s20 = smov [#allocation5]  }
   0x6   :  { %s29_s21 = sshll.u32 %s242_s20, 4  ;;  %s30_s21 = int_to_ptr.vmem [resolvable:$true] %s29_s21 }
   0x7   :  { %32 = dma.hbm_to_vmem [thread:$0]  %s28_s19, 128, %s30_s21, [#allocation6]  }
   0x8   :  { %235 = dma.done.wait [#allocation3], 128  }
   0x9   :  { %236 = vsyncadd [#allocation3], 4294967168 }
   0xa   :  { %237 = dma.done.wait [#allocation6], 128  }
   0xb   :  { %238 = vsyncadd [#allocation6], 4294967168  ;;  %v43_v0 = vld [vmem:[#allocation5] sm:$0xff]  ;;  %v44_v1 = vld [vmem:[#allocation2] sm:$0xff]  ;;  %vm47_vm0 = vcmask 261120   ;;  %v243_v5 = vmov 0   ;;  %v95_v39 = vlaneseq }
   0xc   :  { %v45_v2 = vsub.f32 %v43_v0, %v44_v1  ;;  %159 = vset.pattern.permute.xlu0 %v243_v5  ;;  %160 = vset.pattern.permute.xlu1 %v243_v5  ;;  %v51_v42 = vld [vmem:[%s279_s2] sm:$0x1]  ;;  %s244_s22 = smov [#allocation7]   ;;  %s144_s26 = sshll.u32 %s280_s3, 4  ;;  %vm135_vm3 = vcmask 57344   ;;  %s145_s26 = int_to_ptr.hbm [resolvable:$true] %s144_s26 }
   0xd   :  { %v96_v40 = vand.u32 127, %v95_v39  ;;  %v100_v44 = vsub.f32 1.0, %v51_v42  ;;  %s142_s23 = sshll.u32 %s244_s22, 4  ;;  %s143_s23 = int_to_ptr.vmem [resolvable:$true] %s142_s23 }
   0xe   :  { %v46_v3 = vmul.f32 %v45_v2, %v45_v2 }
  0x10   :  { %v48_v4 = vsel %vm47_vm0, %v46_v3, 0.0 }
  0x11   :  { %49 = vadd.xlane.f32.xlu0 %v48_v4 }
  0x84   :  { %v50_v6 = vpop.xlane.xlu0 %49 }
  0x85   :  { %v52_v7 = vadd.f32 1e-09, %v50_v6  ;;  %v68_v8 = vperm.slane %v50_v6, 0  ;;  %v69_v9 = vperm.slane %v50_v6, 1  ;;  %v70_v10 = vperm.slane %v50_v6, 2 }
  0x86   :  { %v71_v11 = vperm.slane %v50_v6, 3  ;;  %v72_v12 = vperm.slane %v50_v6, 4  ;;  %v73_v13 = vperm.slane %v50_v6, 5  ;;  %v74_v14 = vperm.slane %v50_v6, 6 }
  0x87   :  { %161 = vrsqrt.f32 %v52_v7  ;;  %76 = vst [vmem:[#allocation1] ss:$9 sm:$0xff] %v68_v8  ;;  %v75_v15 = vperm.slane %v50_v6, 7  ;;  %vm60_vm1 = vcmp.eq.f32.partialorder %v52_v7, inf  ;;  %v63_v24 = vand.u32 2147483648, %v52_v7 }
  0x88   :  { %78 = vst [vmem:[#allocation1 + $0x1] ss:$9 sm:$0xff] %v69_v9  ;;  %vm62_vm2 = vcmp.eq.f32.partialorder %v52_v7, 0.0 }
  0x89   :  { %80 = vst [vmem:[#allocation1 + $0x2] ss:$9 sm:$0xff] %v70_v10 }
  0x8a   :  { %82 = vst [vmem:[#allocation1 + $0x3] ss:$9 sm:$0xff] %v71_v11 }
  0x8b   :  { %84 = vst [vmem:[#allocation1 + $0x4] ss:$9 sm:$0xff] %v72_v12 }
  0x8c   :  { %86 = vst [vmem:[#allocation1 + $0x5] ss:$9 sm:$0xff] %v73_v13 }
  0x8d   :  { %v162_v16 = vpop.eup %161  ;;  %88 = vst [vmem:[#allocation1 + $0x6] ss:$9 sm:$0xff] %v74_v14 }
  0x8e   :  { %v54_v17 = vmul.f32 %v162_v16, %v52_v7  ;;  %90 = vst [vmem:[#allocation1 + $0x7] ss:$9 sm:$0xff] %v75_v15 }
  0x90   :  { %v55_v18 = vmul.f32 %v162_v16, %v54_v17 }
  0x92   :  { %v56_v19 = vmul.f32 0.5, %v55_v18 }
  0x94   :  { %v57_v20 = vsub.f32 1.5, %v56_v19 }
  0x95   :  { %v91_v21 = vld [vmem:[#allocation1] sm:$0xff] }
  0x96   :  { %v58_v22 = vmul.f32 %v162_v16, %v57_v20  ;;  %93 = vperm.xlu0 %159, %v91_v21  }
  0x98   :  { %v59_v23 = vmul.f32 %v58_v22, %v52_v7 }
  0x9a   :  { %v61_v25 = vsel %vm60_vm1, %v52_v7, %v59_v23 }
  0x9b   :  { %v64_v26 = vsel %vm62_vm2, %v63_v24, %v61_v25 }
  0x9c   :  { %v65_v27 = vsub.f32 1.0, %v64_v26 }
  0x9e   :  { %v66_v28 = vmax.f32 %v65_v27, 0.0 }
  0xa0   :  { %v101_v29 = vmul.f32 %v66_v28, %v66_v28 }
  0xa2   :  { %v103_v30 = vperm.slane %v101_v29, 0  ;;  %v104_v31 = vperm.slane %v101_v29, 1  ;;  %v105_v32 = vperm.slane %v101_v29, 2  ;;  %v106_v33 = vperm.slane %v101_v29, 3 }
  0xa3   :  { %v107_v34 = vperm.slane %v101_v29, 4  ;;  %v108_v35 = vperm.slane %v101_v29, 5  ;;  %v109_v36 = vperm.slane %v101_v29, 6  ;;  %v110_v37 = vperm.slane %v101_v29, 7 }
  0xa4   :  { %111 = vst [vmem:[#allocation1] ss:$9 sm:$0xff] %v103_v30 }
  0xa5   :  { %113 = vst [vmem:[#allocation1 + $0x1] ss:$9 sm:$0xff] %v104_v31 }
  0xa6   :  { %115 = vst [vmem:[#allocation1 + $0x2] ss:$9 sm:$0xff] %v105_v32 }
  0xa7   :  { %117 = vst [vmem:[#allocation1 + $0x3] ss:$9 sm:$0xff] %v106_v33 }
  0xa8   :  { %119 = vst [vmem:[#allocation1 + $0x4] ss:$9 sm:$0xff] %v107_v34 }
  0xa9   :  { %121 = vst [vmem:[#allocation1 + $0x5] ss:$9 sm:$0xff] %v108_v35 }
  0xaa   :  { %123 = vst [vmem:[#allocation1 + $0x6] ss:$9 sm:$0xff] %v109_v36 }
  0xab   :  { %125 = vst [vmem:[#allocation1 + $0x7] ss:$9 sm:$0xff] %v110_v37 }
  0xb2   :  { %v126_v38 = vld [vmem:[#allocation1] sm:$0xff] }
  0xb3   :  { %128 = vperm.xlu1 %160, %v126_v38  }
 0x108   :  { %v94_v41 = vpop.permute.xlu0 %93 }
 0x109   :  { %v97_v43 = vperm.slane %v94_v41, %v96_v40 }
 0x10b   :  { %v99_v47 = vmul.f32 %v97_v43, %v51_v42 }
 0x125   :  { %v129_v45 = vpop.permute.xlu1 %128 }
 0x126   :  { %v130_v46 = vperm.slane %v129_v45, %v96_v40 }
 0x128   :  { %v132_v48 = vmul.f32 %v130_v46, %v100_v44 }
 0x12a   :  { %v133_v49 = vadd.f32 %v132_v48, %v99_v47 }
 0x12c   :  { %v134_v50 = vmul.f32 0.5, %v133_v49 }
 0x12e   :  { %136 = vst.msk [vmem:[#allocation7] sm:$0x1] %vm135_vm3, %v134_v50 }
 0x12f   :  { %147 = dma.vmem_to_hbm [thread:$0]  %s143_s23, 16, %s145_s26, [#allocation4]  }
 0x130   :  { %239 = dma.done.wait [#allocation4], 16  }
 0x131   :  { %240 = vsyncadd [#allocation4], 4294967280 }
 0x132   :  { %152 = vsyncpa [#allocation3], 1 }
 0x133   :  { %153 = vsyncpa [#allocation6], 1 }
 0x134   :  { %154 = vsyncpa [#allocation4], 1 }

</bundles_post_ra>
